<compile_context>
chip_gen: v7x
topology: tpu7x:2x2x1
jax: 0.10.0
libtpu: 0.0.40
codegen_flags: <defaults>
</compile_context>

<pallas_src>
import functools

import jax
import jax.numpy as jnp
from jax.experimental import pallas as pl
from jax.experimental.pallas import tpu as pltpu


def _contrastive_loss_kernel(pred_hbm_ref, targ_ref, p2_ref, dcol_ref, drow_ref,
                             col_out_ref, row_out_ref,
                             pred_vmem, col_acc, row_acc, copy_sem,
                             *, inv_temperature, tile_rows):
    i = pl.program_id(1)

    @pl.when(i == 0)
    def _prologue():
        # One resident copy of `prediction` per TensorCore partition (guarded on
        # the inner index only so each megacore partition loads its own copy).
        cp = pltpu.make_async_copy(pred_hbm_ref, pred_vmem, copy_sem.at[0])
        cp.start()
        cp.wait()
        col_acc[...] = jnp.zeros_like(col_acc)
        row_acc[...] = jnp.zeros_like(row_acc)

    inv_temp = jnp.float32(inv_temperature)
    pred = pred_vmem[...]                          # (N, Dp), native dtype (bf16 ok)
    targ = targ_ref[...]                           # (tile, Dp)
    targ_f = targ.astype(jnp.float32)
    n = pred_vmem.shape[0]

    # Cross term on the MXU; HIGHEST keeps f32 inputs at full precision
    # (bf16 inputs stay native with f32 accumulation).
    cross = jax.lax.dot_general(
        targ, pred, (((1,), (1,)), ((), ())),
        precision=jax.lax.Precision.HIGHEST,
        preferred_element_type=jnp.float32)                       # (tile, N)
    t2 = jnp.sum(targ_f * targ_f, axis=1, keepdims=True)          # (tile, 1)
    d2 = jnp.maximum(t2 + p2_ref[...] - 2.0 * cross, 0.0)
    logits = -jnp.sqrt(d2) * inv_temp                             # (tile, N)

    # Row direction: shift by the row's own diagonal (label) logit.  The
    # shifted sum contains exp(~0)=1 so it never underflows, and the label
    # term cancels analytically with the shift.  Row sum on the MXU.
    e_row = jnp.exp(logits - drow_ref[...])                       # (tile, N)
    ones_n1 = jnp.ones((n, 1), jnp.float32)
    row_sum = jax.lax.dot_general(
        e_row, ones_n1, (((1,), (0,)), ((), ())),
        precision=jax.lax.Precision.HIGHEST,
        preferred_element_type=jnp.float32)                       # (tile, 1)
    row_acc[...] += jnp.sum(jnp.log(row_sum), keepdims=True)      # (1, 1)

    # Column direction: shift by each column's diagonal logit; accumulate the
    # shifted exp-sums across row tiles (log happens in the XLA epilogue once
    # every tile, incl. the one holding the diagonal, has contributed).
    e_col = jnp.exp(logits - dcol_ref[...])                       # (tile, N)
    ones_1t = jnp.ones((1, tile_rows), jnp.float32)
    col_acc[...] += jax.lax.dot_general(
        ones_1t, e_col, (((1,), (0,)), ((), ())),
        precision=jax.lax.Precision.HIGHEST,
        preferred_element_type=jnp.float32)                       # (1, N)

    @pl.when(i == pl.num_programs(1) - 1)
    def _epilogue():
        col_out_ref[...] = col_acc[...].reshape(col_out_ref.shape)
        row_out_ref[...] = row_acc[...].reshape(row_out_ref.shape)


def _vmem_bytes(n, d_pad, tile, itemsize):
    """Estimated VMEM footprint: drives tile selection and vmem_limit_bytes."""
    pred_resident = n * d_pad * itemsize               # single VMEM scratch copy
    targ_pipeline = 2 * tile * d_pad * itemsize        # double-buffered row tiles
    vec_inputs = 2 * (2 * n * 4 + tile * 4)            # p2 / diag vectors (2-buffered)
    scratch = (n + 8) * 4                              # col / row accumulators
    temps = 5 * tile * n * 4                           # cross/d2/logits/e_row/e_col f32
    outs = 2 * (n + 1) * 4
    return pred_resident + targ_pipeline + vec_inputs + scratch + temps + outs


def _pick_tile_rows(n, d_pad, itemsize, max_tile_rows=256,
                    vmem_budget_bytes=44 * 1024 * 1024):
    """Largest row tile that divides N, is a multiple of 8 and keeps the
    estimated footprint under a budget that is safe on v7x (64 MiB physical)."""
    if n % 8 != 0:
        return n                                        # single full-array tile fallback
    tile = max(8, (min(max_tile_rows, n) // 8) * 8)
    while tile > 8 and (n % tile != 0
                        or _vmem_bytes(n, d_pad, tile, itemsize) > vmem_budget_bytes):
        tile -= 8
    return tile


def contrastive_distance_loss(prediction, target, temperature=1.0,
                              max_tile_rows=256):
    assert prediction.shape == target.shape and prediction.ndim == 2
    n, d = prediction.shape

    # Cheap O(N*D) precomputations in XLA: squared prediction norms (lane
    # layout) and the diagonal (label) logits in both layouts.
    pred_f = prediction.astype(jnp.float32)
    targ_f = target.astype(jnp.float32)
    p2 = jnp.sum(pred_f * pred_f, axis=1).reshape(1, n)
    diag = -jnp.sqrt(jnp.sum((pred_f - targ_f) ** 2, axis=1)) / jnp.float32(temperature)
    diag_col = diag.reshape(1, n)       # per-column (prediction) label logits
    diag_row = diag.reshape(n, 1)       # per-row (target) label logits

    # Zero-pad the feature axis to the 128-lane width (L2 distances unchanged).
    d_pad = ((d + 127) // 128) * 128
    if d_pad != d:
        pad = ((0, 0), (0, d_pad - d))
        prediction = jnp.pad(prediction, pad)
        target = jnp.pad(target, pad)

    itemsize = jnp.dtype(prediction.dtype).itemsize
    tile = _pick_tile_rows(n, d_pad, itemsize, max_tile_rows)
    n_tiles = n // tile
    n_part = 2 if (n_tiles % 2 == 0) else 1             # engage both v7x TensorCores
    inner = n_tiles // n_part

    vmem_need = _vmem_bytes(n, d_pad, tile, itemsize)
    vmem_limit = int(min(max(int(vmem_need * 1.3), 16 * 1024 * 1024),
                         100 * 1024 * 1024))

    kernel = functools.partial(_contrastive_loss_kernel,
                               inv_temperature=1.0 / float(temperature),
                               tile_rows=tile)
    cost = pl.CostEstimate(
        flops=int(2 * n * n * d_pad + 4 * n * n),
        transcendentals=int(3 * n * n),
        bytes_accessed=int((1 + n_part) * n * d_pad * itemsize + 24 * n))

    col_parts, row_parts = pl.pallas_call(
        kernel,
        out_shape=(jax.ShapeDtypeStruct((n_part, 1, n), jnp.float32),
                   jax.ShapeDtypeStruct((n_part, 1, 1), jnp.float32)),
        grid_spec=pltpu.PrefetchScalarGridSpec(
            num_scalar_prefetch=0,
            grid=(n_part, inner),
            in_specs=[
                pl.BlockSpec(memory_space=pl.ANY),                          # prediction (HBM)
                pl.BlockSpec((tile, d_pad), lambda p, i: (p * inner + i, 0)),  # target tiles
                pl.BlockSpec((1, n), lambda p, i: (0, 0)),                  # ||pred||^2
                pl.BlockSpec((1, n), lambda p, i: (0, 0)),                  # diag (col layout)
                pl.BlockSpec((tile, 1), lambda p, i: (p * inner + i, 0)),   # diag (row tiles)
            ],
            out_specs=[
                pl.BlockSpec((1, 1, n), lambda p, i: (p, 0, 0)),            # column exp sums
                pl.BlockSpec((1, 1, 1), lambda p, i: (p, 0, 0)),            # sum row log terms
            ],
            scratch_shapes=[
                pltpu.VMEM((n, d_pad), prediction.dtype),   # resident prediction (1 buffer)
                pltpu.VMEM((1, n), jnp.float32),            # column exp-sum accumulator
                pltpu.VMEM((1, 1), jnp.float32),            # sum of row log terms
                pltpu.SemaphoreType.DMA((1,)),              # prediction copy semaphore
            ]),
        compiler_params=pltpu.CompilerParams(
            dimension_semantics=("parallel", "arbitrary"),
            vmem_limit_bytes=vmem_limit),
        cost_estimate=cost,
    )(prediction, target, p2, diag_col, diag_row)

    # Tiny XLA epilogue combining the per-partition partial results.
    col_total = jnp.sum(col_parts, axis=0)                        # (1, N)
    loss = (jnp.sum(row_parts) + jnp.sum(jnp.log(col_total))) / jnp.float32(2 * n)
    return loss


def _reference_loss(prediction, target, temperature=1.0):
    # Pure-JAX mirror of the torch forward with Euclidean distance_metric.
    diff = prediction[None, :, :] - target[:, None, :]             # (N, N, D)
    dist = jnp.sqrt(jnp.sum(diff * diff, axis=-1))                 # (N, N)
    logits = -dist / temperature
    n = target.shape[0]
    labels = jnp.arange(n)

    def ce(lg):
        lse = jax.nn.logsumexp(lg, axis=1)
        picked = lg[jnp.arange(n), labels]
        return jnp.mean(lse - picked)

    return (ce(logits) + ce(logits.T)) / 2.0


if __name__ == "__main__":
    N, D = 64, 96      # D deliberately not a multiple of 128 to exercise padding
    key = jax.random.PRNGKey(0)
    k1, k2 = jax.random.split(key)
    prediction = jax.random.normal(k1, (N, D), dtype=jnp.float32)
    target = jax.random.normal(k2, (N, D), dtype=jnp.float32)
    temperature = 0.5

    ref = _reference_loss(prediction, target, temperature)

    # Multi-tile path: tile=16 -> 4 row tiles -> grid (2 partitions, 2 steps);
    # exercises the parallel partition axis, pipelining and the accumulators.
    loss_tiled = contrastive_distance_loss(prediction, target, temperature,
                                           max_tile_rows=16)
    loss_tiled = jax.block_until_ready(loss_tiled)
    assert jnp.allclose(loss_tiled, ref, rtol=1e-3, atol=1e-3), (loss_tiled, ref)

    # Default path: single row tile, single partition.
    loss_single = contrastive_distance_loss(prediction, target, temperature)
    loss_single = jax.block_until_ready(loss_single)
    assert jnp.allclose(loss_single, ref, rtol=1e-3, atol=1e-3), (loss_single, ref)

    print("KERNEL_OK")
</pallas_src>

<mosaic_0001>
module attributes {stable_mosaic.version = 11 : i64} {
  func.func @_contrastive_loss_kernel(%arg0: i32, %arg1: i32, %arg2: memref<64x128xf32, #tpu.memory_space<any>>, %arg3: memref<16x128xf32, #tpu.memory_space<vmem>>, %arg4: memref<1x64xf32, #tpu.memory_space<vmem>>, %arg5: memref<1x64xf32, #tpu.memory_space<vmem>>, %arg6: memref<16x1xf32, #tpu.memory_space<vmem>>, %arg7: memref<1x1x64xf32, #tpu.memory_space<vmem>>, %arg8: memref<1x1x1xf32, #tpu.memory_space<vmem>>, %arg9: memref<64x128xf32, #tpu.memory_space<vmem>>, %arg10: memref<1x64xf32, #tpu.memory_space<vmem>>, %arg11: memref<1x1xf32, #tpu.memory_space<vmem>>, %arg12: memref<1x!tpu.dma_semaphore, #tpu.memory_space<semaphore_mem>>) attributes {dimension_semantics = [#tpu.dimension_semantics<parallel>, #tpu.dimension_semantics<arbitrary>], iteration_bounds = array<i64: 2, 2>, scalar_prefetch = 0 : i64, scratch_operands = 4 : i64, tpu.core_type = #tpu.core_type<tc>, window_params = [{}, {transform_indices = @transform_1, window_bounds = array<i64: 16, 128>}, {pipeline_mode = #tpu.pipeline_mode<synchronous>, transform_indices = @transform_2, window_bounds = array<i64: 1, 64>}, {pipeline_mode = #tpu.pipeline_mode<synchronous>, transform_indices = @transform_3, window_bounds = array<i64: 1, 64>}, {transform_indices = @transform_4, window_bounds = array<i64: 16, 1>}, {transform_indices = @transform_5, window_bounds = array<i64: 1, 1, 64>}, {transform_indices = @transform_6, window_bounds = array<i64: 1, 1, 1>}]} {
    %c0_i32 = arith.constant 0 : i32
    %0 = arith.cmpi eq, %arg1, %c0_i32 : i32
    %1 = arith.extui %0 : i1 to i32
    %c0_i32_0 = arith.constant 0 : i32
    %2 = arith.cmpi ne, %1, %c0_i32_0 : i32
    scf.if %2 {
      %c0_i32_29 = arith.constant 0 : i32
      %50 = tpu.memref_slice %arg12[%c0_i32_29] : memref<1x!tpu.dma_semaphore, #tpu.memory_space<semaphore_mem>> -> memref<1x!tpu.dma_semaphore, #tpu.memory_space<semaphore_mem>>
      %51 = tpu.memref_squeeze %50 : memref<1x!tpu.dma_semaphore, #tpu.memory_space<semaphore_mem>> -> memref<!tpu.dma_semaphore, #tpu.memory_space<semaphore_mem>>
      tpu.enqueue_dma source(%arg2 : memref<64x128xf32, #tpu.memory_space<any>>) target(%arg9 : memref<64x128xf32, #tpu.memory_space<vmem>>) target_semaphore(%51 : memref<!tpu.dma_semaphore, #tpu.memory_space<semaphore_mem>>)
      %c0_i32_30 = arith.constant 0 : i32
      %52 = tpu.memref_slice %arg12[%c0_i32_30] : memref<1x!tpu.dma_semaphore, #tpu.memory_space<semaphore_mem>> -> memref<1x!tpu.dma_semaphore, #tpu.memory_space<semaphore_mem>>
      %53 = tpu.memref_squeeze %52 : memref<1x!tpu.dma_semaphore, #tpu.memory_space<semaphore_mem>> -> memref<!tpu.dma_semaphore, #tpu.memory_space<semaphore_mem>>
      tpu.wait_dma2 semaphore(%53 : memref<!tpu.dma_semaphore, #tpu.memory_space<semaphore_mem>>) src(%arg2 : memref<64x128xf32, #tpu.memory_space<any>>) dst(%arg9 : memref<64x128xf32, #tpu.memory_space<vmem>>)
      %cst_31 = arith.constant 0.000000e+00 : f32
      %54 = vector.broadcast %cst_31 : f32 to vector<1x64xf32>
      %c0_32 = arith.constant 0 : index
      %c0_33 = arith.constant 0 : index
      %55 = vector.load %arg10[%c0_32, %c0_33] : memref<1x64xf32, #tpu.memory_space<vmem>>, vector<1x64xf32>
      tpu.vector_store %arg10[%c0_32, %c0_33], %54 {strides = array<i32>} : memref<1x64xf32, #tpu.memory_space<vmem>>, vector<1x64xf32>,
      %cst_34 = arith.constant 0.000000e+00 : f32
      %56 = vector.broadcast %cst_34 : f32 to vector<1x1xf32>
      %c0_35 = arith.constant 0 : index
      %c0_36 = arith.constant 0 : index
      %57 = vector.load %arg11[%c0_35, %c0_36] : memref<1x1xf32, #tpu.memory_space<vmem>>, vector<1x1xf32>
      tpu.vector_store %arg11[%c0_35, %c0_36], %56 {strides = array<i32>} : memref<1x1xf32, #tpu.memory_space<vmem>>, vector<1x1xf32>,
    } else {
    }
    %c0 = arith.constant 0 : index
    %c0_1 = arith.constant 0 : index
    %3 = vector.load %arg9[%c0, %c0_1] : memref<64x128xf32, #tpu.memory_space<vmem>>, vector<64x128xf32>
    %c0_2 = arith.constant 0 : index
    %c0_3 = arith.constant 0 : index
    %4 = vector.load %arg3[%c0_2, %c0_3] : memref<16x128xf32, #tpu.memory_space<vmem>>, vector<16x128xf32>
    %cst = arith.constant dense<0.000000e+00> : vector<16x64xf32>
    %5 = tpu.matmul %4, %3, %cst {dimension_numbers = #tpu.dot_dimension_numbers<[1], [1], [0], [0], [0, 0, 1, 0], [], []>, precision = #tpu.contract_precision<fp32>} : vector<16x128xf32>, vector<64x128xf32>, vector<16x64xf32> -> vector<16x64xf32>
    %6 = arith.mulf %4, %4 : vector<16x128xf32>
    %cst_4 = arith.constant dense<0.000000e+00> : vector<16xf32>
    %7 = vector.multi_reduction <add>, %6, %cst_4 [1] : vector<16x128xf32> to vector<16xf32>
    %8 = vector.shape_cast %7 : vector<16xf32> to vector<16x1xf32>
    %c0_5 = arith.constant 0 : index
    %c0_6 = arith.constant 0 : index
    %9 = vector.load %arg4[%c0_5, %c0_6] : memref<1x64xf32, #tpu.memory_space<vmem>>, vector<1x64xf32>
    %10 = vector.broadcast %8 : vector<16x1xf32> to vector<16x64xf32>
    %11 = vector.broadcast %9 : vector<1x64xf32> to vector<16x64xf32>
    %12 = arith.addf %10, %11 : vector<16x64xf32>
    %cst_7 = arith.constant 2.000000e+00 : f32
    %13 = vector.broadcast %cst_7 : f32 to vector<16x64xf32>
    %14 = arith.mulf %13, %5 : vector<16x64xf32>
    %15 = arith.subf %12, %14 : vector<16x64xf32>
    %cst_8 = arith.constant 0.000000e+00 : f32
    %16 = vector.broadcast %cst_8 : f32 to vector<16x64xf32>
    %17 = arith.maximumf %15, %16 : vector<16x64xf32>
    %18 = math.sqrt %17 : vector<16x64xf32>
    %cst_9 = arith.constant 0.000000e+00 : f32
    %19 = vector.broadcast %cst_9 : f32 to vector<16x64xf32>
    %20 = arith.subf %19, %18 : vector<16x64xf32>
    %cst_10 = arith.constant 2.000000e+00 : f32
    %21 = vector.broadcast %cst_10 : f32 to vector<16x64xf32>
    %22 = arith.mulf %20, %21 : vector<16x64xf32>
    %c0_11 = arith.constant 0 : index
    %c0_12 = arith.constant 0 : index
    %23 = vector.load %arg6[%c0_11, %c0_12] : memref<16x1xf32, #tpu.memory_space<vmem>>, vector<16x1xf32>
    %24 = vector.broadcast %23 : vector<16x1xf32> to vector<16x64xf32>
    %25 = arith.subf %22, %24 : vector<16x64xf32>
    %26 = math.exp %25 : vector<16x64xf32>
    %cst_13 = arith.constant 1.000000e+00 : f32
    %27 = vector.broadcast %cst_13 : f32 to vector<64x1xf32>
    %cst_14 = arith.constant dense<0.000000e+00> : vector<16x1xf32>
    %28 = tpu.matmul %26, %27, %cst_14 {dimension_numbers = #tpu.dot_dimension_numbers<[1], [0], [0], [1], [0, 0, 1, 1], [], []>, precision = #tpu.contract_precision<fp32>} : vector<16x64xf32>, vector<64x1xf32>, vector<16x1xf32> -> vector<16x1xf32>
    %c0_15 = arith.constant 0 : index
    %c0_16 = arith.constant 0 : index
    %29 = vector.load %arg11[%c0_15, %c0_16] : memref<1x1xf32, #tpu.memory_space<vmem>>, vector<1x1xf32>
    %30 = math.log %28 : vector<16x1xf32>
    %31 = vector.shape_cast %30 : vector<16x1xf32> to vector<1x16x1xf32>
    %cst_17 = arith.constant dense<0.000000e+00> : vector<1xf32>
    %32 = vector.multi_reduction <add>, %31, %cst_17 [1, 2] : vector<1x16x1xf32> to vector<1xf32>
    %33 = vector.shape_cast %32 : vector<1xf32> to vector<1x1x1xf32>
    %34 = vector.extract %33[0, 0, 0] : f32 from vector<1x1x1xf32>
    %35 = vector.broadcast %34 : f32 to vector<1x1xf32>
    %36 = arith.addf %29, %35 : vector<1x1xf32>
    %c0_18 = arith.constant 0 : index
    %c0_19 = arith.constant 0 : index
    %37 = vector.load %arg11[%c0_18, %c0_19] : memref<1x1xf32, #tpu.memory_space<vmem>>, vector<1x1xf32>
    tpu.vector_store %arg11[%c0_18, %c0_19], %36 {strides = array<i32>} : memref<1x1xf32, #tpu.memory_space<vmem>>, vector<1x1xf32>,
    %c0_20 = arith.constant 0 : index
    %c0_21 = arith.constant 0 : index
    %38 = vector.load %arg5[%c0_20, %c0_21] : memref<1x64xf32, #tpu.memory_space<vmem>>, vector<1x64xf32>
    %39 = vector.broadcast %38 : vector<1x64xf32> to vector<16x64xf32>
    %40 = arith.subf %22, %39 : vector<16x64xf32>
    %41 = math.exp %40 : vector<16x64xf32>
    %cst_22 = arith.constant 1.000000e+00 : f32
    %42 = vector.broadcast %cst_22 : f32 to vector<1x16xf32>
    %c0_23 = arith.constant 0 : index
    %c0_24 = arith.constant 0 : index
    %43 = vector.load %arg10[%c0_23, %c0_24] : memref<1x64xf32, #tpu.memory_space<vmem>>, vector<1x64xf32>
    %cst_25 = arith.constant dense<0.000000e+00> : vector<1x64xf32>
    %44 = tpu.matmul %42, %41, %cst_25 {dimension_numbers = #tpu.dot_dimension_numbers<[1], [0], [0], [1], [0, 0, 1, 1], [], []>, precision = #tpu.contract_precision<fp32>} : vector<1x16xf32>, vector<16x64xf32>, vector<1x64xf32> -> vector<1x64xf32>
    %45 = arith.addf %43, %44 : vector<1x64xf32>
    %c0_26 = arith.constant 0 : index
    %c0_27 = arith.constant 0 : index
    %46 = vector.load %arg10[%c0_26, %c0_27] : memref<1x64xf32, #tpu.memory_space<vmem>>, vector<1x64xf32>
    tpu.vector_store %arg10[%c0_26, %c0_27], %45 {strides = array<i32>} : memref<1x64xf32, #tpu.memory_space<vmem>>, vector<1x64xf32>,
    %c1_i32 = arith.constant 1 : i32
    %47 = arith.cmpi eq, %arg1, %c1_i32 : i32
    %48 = arith.extui %47 : i1 to i32
    %c0_i32_28 = arith.constant 0 : i32
    %49 = arith.cmpi ne, %48, %c0_i32_28 : i32
    scf.if %49 {
      %c0_29 = arith.constant 0 : index
      %c0_30 = arith.constant 0 : index
      %50 = vector.load %arg10[%c0_29, %c0_30] : memref<1x64xf32, #tpu.memory_space<vmem>>, vector<1x64xf32>
      %51 = vector.shape_cast %50 : vector<1x64xf32> to vector<1x1x64xf32>
      %c0_31 = arith.constant 0 : index
      %c0_32 = arith.constant 0 : index
      %c0_33 = arith.constant 0 : index
      %52 = vector.load %arg7[%c0_31, %c0_32, %c0_33] : memref<1x1x64xf32, #tpu.memory_space<vmem>>, vector<1x1x64xf32>
      tpu.vector_store %arg7[%c0_31, %c0_32, %c0_33], %51 {strides = array<i32>} : memref<1x1x64xf32, #tpu.memory_space<vmem>>, vector<1x1x64xf32>,
      %c0_34 = arith.constant 0 : index
      %c0_35 = arith.constant 0 : index
      %53 = vector.load %arg11[%c0_34, %c0_35] : memref<1x1xf32, #tpu.memory_space<vmem>>, vector<1x1xf32>
      %54 = vector.shape_cast %53 : vector<1x1xf32> to vector<1x1x1xf32>
      %c0_36 = arith.constant 0 : index
      %c0_37 = arith.constant 0 : index
      %c0_38 = arith.constant 0 : index
      %55 = vector.load %arg8[%c0_36, %c0_37, %c0_38] : memref<1x1x1xf32, #tpu.memory_space<vmem>>, vector<1x1x1xf32>
      tpu.vector_store %arg8[%c0_36, %c0_37, %c0_38], %54 {strides = array<i32>} : memref<1x1x1xf32, #tpu.memory_space<vmem>>, vector<1x1x1xf32>,
    } else {
    }
    return
  }
  func.func @transform_1(%arg0: i32, %arg1: i32) -> (i32, i32) {
    %c2_i32 = arith.constant 2 : i32
    %0 = arith.muli %arg0, %c2_i32 : i32
    %1 = arith.addi %0, %arg1 : i32
    %c0_i32 = arith.constant 0 : i32
    %c0_i32_0 = arith.constant 0 : i32
    return %1, %c0_i32 : i32, i32
  }
  func.func @transform_2(%arg0: i32, %arg1: i32) -> (i32, i32) {
    %c0_i32 = arith.constant 0 : i32
    %c0_i32_0 = arith.constant 0 : i32
    %c0_i32_1 = arith.constant 0 : i32
    return %c0_i32, %c0_i32_0 : i32, i32
  }
  func.func @transform_3(%arg0: i32, %arg1: i32) -> (i32, i32) {
    %c0_i32 = arith.constant 0 : i32
    %c0_i32_0 = arith.constant 0 : i32
    %c0_i32_1 = arith.constant 0 : i32
    return %c0_i32, %c0_i32_0 : i32, i32
  }
  func.func @transform_4(%arg0: i32, %arg1: i32) -> (i32, i32) {
    %c2_i32 = arith.constant 2 : i32
    %0 = arith.muli %arg0, %c2_i32 : i32
    %1 = arith.addi %0, %arg1 : i32
    %c0_i32 = arith.constant 0 : i32
    %c0_i32_0 = arith.constant 0 : i32
    return %1, %c0_i32 : i32, i32
  }
  func.func @transform_5(%arg0: i32, %arg1: i32) -> (i32, i32, i32) {
    %c0_i32 = arith.constant 0 : i32
    %c0_i32_0 = arith.constant 0 : i32
    %c0_i32_1 = arith.constant 0 : i32
    return %arg0, %c0_i32, %c0_i32_0 : i32, i32, i32
  }
  func.func @transform_6(%arg0: i32, %arg1: i32) -> (i32, i32, i32) {
    %c0_i32 = arith.constant 0 : i32
    %c0_i32_0 = arith.constant 0 : i32
    %c0_i32_1 = arith.constant 0 : i32
    return %arg0, %c0_i32, %c0_i32_0 : i32, i32, i32
  }
}

</mosaic_0001>

<bundles_post_ra>
// kernel: tpu_custom_call.1
= control target key start
LH: loop header
LB: loop body
LE: loop exit
PB: predicated region body
PF: predicated region fallthrough
CT: control target
= control target key end

     0   :  { %s3472_s0 = inlined_call_operand.vmem [shape: f32[64,128], index: 0, kind: input, shape index: {}]   ;;  %s3473_s1 = inlined_call_operand.hbm [shape: f32[64,128], index: 1, kind: input, shape index: {}]   ;;  %s3474_s2 = inlined_call_operand.vmem [shape: f32[1,64], index: 2, kind: input, shape index: {}]   ;;  %s3475_s3 = inlined_call_operand.vmem [shape: f32[1,64], index: 3, kind: input, shape index: {}]   ;;  %s3476_s4 = inlined_call_operand.vmem [shape: f32[64,1], index: 4, kind: input, shape index: {}]   ;;  %s3477_s5 = inlined_call_operand.hbm [shape: f32[2,1,64], index: 5, kind: output, shape index: {0}]   ;;  %s3478_s6 = inlined_call_operand.vmem [shape: f32[2,1,1], index: 6, kind: output, shape index: {1}]  }
   0x1   :  { %3486 = sst [smem:[#allocation20_spill]] %s3473_s1 }
   0x2   :  { %3487 = sst [smem:[#allocation21_spill]] %s3477_s5 }
   0x3   :  { %12 = vsyncpa [#allocation7], 0 }
   0x4   :  { %14 = vsyncpa [#allocation7 + $0x1], 0 }
   0x5   :  { %15 = vsyncpa [#allocation8], 0 }
   0x6   :  { %17 = vsyncpa [#allocation8 + $0x1], 0  ;;  %s3024_s21 = smov 0   ;;  %s3026_s22 = smov 0  }
   0x7   :  { %s3028_s23 = smov 0   ;;  %s3030_s24 = smov 0  }
   0x8   :  { %s3032_s25 = smov 0   ;;  %s3034_s26 = smov 0  }
   0x9   :  { %s3036_s27 = smov 0   ;;  %s3038_s28 = smov 0  }
   0xa   :  { %s3040_s29 = smov 0   ;;  %s3042_s30 = smov 0  }
   0xb   :  { %s3044_s7 = smov 0  }
   0xc LB: > { %3488 = sst [smem:[#allocation14_spill]] %s2956_s26  ;;  %s2159_s8 = sadd.s32 4294967295, %s2976_s7   ;;  %s2976_s7 = sphi %s3044_s7, %s23_s7   ;;  %s2972_s30 = sphi %s3042_s30, %s3511_s30   ;;  %s2968_s29 = sphi %s3040_s29, %s3517_s29   ;;  %s2964_s28 = sphi %s3038_s28, %s3509_s28   ;;  %s2960_s27 = sphi %s3036_s27, %s3508_s27   ;;  %s2956_s26 = sphi %s3034_s26, %s3507_s26   ;;  %s2952_s25 = sphi %s3032_s25, %s3516_s25   ;;  %s2948_s24 = sphi %s3030_s24, %s3515_s24   ;;  %s2944_s23 = sphi %s3028_s23, %s3514_s23   ;;  %s2940_s22 = sphi %s3026_s22, %s3513_s22   ;;  %s2936_s21 = sphi %s3024_s21, %s3512_s21  }
   0xd   : > { %3489 = sst [smem:[#allocation15_spill]] %s2968_s29  ;;  %s32_s10 = sadd.s32 1, %s2968_s29 }
   0xe   : > { %3490 = sst [smem:[#allocation16_spill]] %s2972_s30  ;;  %s35_s11 = sadd.s32 1, %s2972_s30 }
   0xf   : > { %p33_p0 = scmp.ge.s32.totalorder %s32_s10, 2  ;;  %s2161_s12 = sshll.u32 %s2972_s30, 1 }
  0x10   : > { %s3083_s13 = sadd.s32 %s2968_s29, %s2161_s12  ;;  %s46_s14 = sadd.s32 1, %s2956_s26 }
  0x11   : > { %s3519_s10 = smov (%p33_p0, %s32_s10), 0  ;;  %s3521_s11 = smov (!%p33_p0, %s35_s11), %s2972_s30 }
  0x12   : > { %3491 = sst [smem:[#allocation17_spill]] %s3519_s10  ;;  %p53_p1 = scmp.ne.s32.totalorder %s2956_s26, %s2952_s25 }
  0x13   : > { %p54_p2 = scmp.eq.s32.totalorder %s2976_s7, 0  ;;  %p37_p3 = scmp.ge.s32.totalorder %s3521_s11, 2 }
  0x14   : > { %p59_p4 = scmp.ne.s32.totalorder %s2952_s25, %s2948_s24  ;;  %p60_p6 = scmp.eq.s32.totalorder %s2159_s8, 0 }
  0x15   : > { %p3093_p5 = por %p54_p2, %p53_p1  ;;  %s3523_s11 = smov (%p37_p3, %s3521_s11), 0 }
  0x16   : > { %3493 = sst [smem:[#allocation18_spill]] %s3523_s11  ;;  %p3099_p7 = por %p60_p6, %p59_p4 }
  0x17   : > { %s144_s17 = sadd.s32 1, %s2944_s23  ;;  %s2162_s18 = sshll.u32 %s3523_s11, 1 }
  0x18   : > { %s141_s19 = ssub.s32 %s2972_s30, %s3523_s11  ;;  %s42_s20 = sadd.s32 %s2162_s18, %s3519_s10 }
  0x19   : > { %p142_p8 = scmp.eq.s32.totalorder %s141_s19, 0  ;;  %s43_s24 = ssub.s32 %s3083_s13, %s42_s20 }
  0x1a   : > { %p154_p9 = scmp.ne.s32.totalorder %s2944_s23, %s2940_s22  ;;  %p44_p10 = scmp.eq.s32.totalorder %s43_s24, 0 }
  0x1b   : > { %p155_p11 = scmp.eq.s32.totalorder %s2159_s8, 3  ;;  %p160_p13 = scmp.ne.s32.totalorder %s2940_s22, %s2936_s21 }
  0x1c   : > { %s3112_s12 = scalar_select %p142_p8, %s2944_s23, %s144_s17  }
  0x1d   : > { %s3115_s9 = scalar_select %p44_p10, %s2956_s26, %s46_s14  }
  0x1e   : > { %p3117_p12 = por %p155_p11, %p154_p9  ;;  %s3497_s5 = sadd.s32 4294967294, %s2976_s7  }
  0x1f   : > { %3495 = sst [smem:[#allocation19_spill]] %s3115_s9  ;;  %p161_p0 = scmp.eq.s32.totalorder %s3497_s5, 3 }
  0x20   : > { %s3496_s29 = scalar_select %p3117_p12, 1, 0 }
  0x21   : > { %p2705_p1 = scmp.lt.s32.totalorder %s2976_s7, 4  ;;  %s213_s11 = sand.u32 1, %s2956_s26  }
  0x22   : > { %p3127_p2 = por %p161_p0, %p160_p13  ;;  %s2167_s19 = sshll.u32 %s213_s11, 4 }
  0x23   : > { %s2187_s20 = sshll.u32 %s3083_s13, 8  ;;  %s3499_s1 = sld [smem:[#allocation20_spill]] }
  0x24   : > { %s3498_s18 = scalar_select %p3127_p2, 1, 0 }
  0x25   : > { %s217_s24 = scalar_lea.vmem [#allocation6], %s2167_s19  ;;  %p3139_p3 = pnand %p2705_p1, %p3093_p5 }
  0x26   : > { %s226_s10 = sshll.u32 %s217_s24, 4  ;;  %s3145_s13 = scalar_lea.sflag [#allocation7], %s213_s11  ;;  %s3143_s10 = int_to_ptr.vmem [resolvable:$true] %s226_s10 }
  0x27   : > { %p2824_p6 = pneg %p3139_p3 }
  0x29   : > { %s3135_s14 = scalar_lea.hbm %s3499_s1, %s2187_s20  ;;  %s2827_s20 = scalar_lea.hbm %s3499_s1, 1024 }
  0x2a   : > { %s2822_s8 = scalar_lea.hbm %s3135_s14, 256  ;;  %p2828_p5 = scmp.lt.u32.totalorder %s3135_s14, %s3499_s1 }
  0x2b   : > { %p2823_p4 = scmp.ne.s32.totalorder %s3135_s14, %s2822_s8  ;;  %p2829_p10 = scmp.lt.u32.totalorder %s2827_s20, %s2822_s8 }
  0x2c   : > { %p2831_p13 = scmp.lt.u32.totalorder %s2822_s8, %s3135_s14 }
  0x2d   : > { %p2825_p8 = pnand %p2824_p6, %p2823_p4  ;;  %p2830_p11 = por %p2829_p10, %p2828_p5 }
  0x2f   : > { %p2826_p9 = pneg %p2825_p8  ;;  %p2832_p0 = por %p2831_p13, %p2830_p11 }
  0x31   : > { %p2833_p1 = pnand %p2832_p0, %p2826_p9 }
  0x33   : > { %2836 = shalt.err (!%p2833_p1)
}
  0x34   : > { %s2837_s11 = scalar_lea.vmem %s3143_s10, 256  ;;  %s2978_s19 = smov [#allocation6]  }
  0x35   : > { %p2838_p4 = scmp.ne.s32.totalorder %s3143_s10, %s2837_s11  ;;  %s2842_s15 = sshll.u32 %s2978_s19, 4  ;;  %s2843_s15 = int_to_ptr.vmem [resolvable:$false] %s2842_s15 }
  0x36   : > { %s2844_s17 = scalar_lea.vmem %s2843_s15, 512  ;;  %p2845_p12 = scmp.lt.s32.totalorder %s3143_s10, %s2843_s15 }
  0x37   : > { %p2840_p8 = pnand %p2838_p4, %p2824_p6  ;;  %p2846_p5 = scmp.lt.s32.totalorder %s2844_s17, %s2837_s11 }
  0x39   : > { %p2841_p2 = pneg %p2840_p8  ;;  %p2847_p10 = por %p2846_p5, %p2845_p12 }
  0x3b   : > { %p2848_p11 = pnand %p2847_p10, %p2841_p2 }
  0x3d   : > { %2851 = shalt.err (!%p2848_p11)
}
  0x3e   : > { %s2979_s8 = smov 128   ;;  %s2980_s20 = smov 8  }
  0x3f   : > { %2700 = dma.hbm_to_vmem [thread:$0]  (!%p3139_p3), %s3135_s14, 256, %s3143_s10, %s3145_s13, %s2979_s8, %s2979_s8, %s2980_s20  }
  0x40   : > { %p2171_p6 = scmp.ge.s32.totalorder %s2976_s7, 1  ;;  %p247_p9 = scmp.lt.s32.totalorder %s2976_s7, 5 }
  0x42   : > { %p248_p13 = pnand %p2171_p6, %p247_p9 }
  0x43   : > { %s253_s24 = sand.u32 (!%p248_p13), 1, %s2952_s25  }
  0x44   : > { %251 = sbr.rel (%p248_p13) target bundleno = 1010 (0x3f2), region = 36  ;;  %s3176_s11 = sshll.u32 (!%p248_p13), %s253_s24, 4 }
  0x45   : > { %s254_s19 = scalar_lea.sflag (!%p248_p13), [#allocation7], %s253_s24 }
  0x4b   : > { %2925 = dma.done.wait (%p3099_p7), %s254_s19, 256  }
  0x4c   : > { %2927 = vsyncadd (%p3099_p7), %s254_s19, 4294967040  ;;  %s286_s10 = sand.u32 1, %s2940_s22   ;;  %s2173_s14 = sshll.u32 %s2964_s28, 1 }
  0x4d   : > { %s297_s5 = sadd.s32 %s2960_s27, %s2173_s14  ;;  %p306_p12 = scmp.lt.s32.totalorder %s2964_s28, 1 }
  0x4e   : > { %s2174_s13 = sshll.u32 %s297_s5, 1  ;;  %s3201_s30 = scalar_lea.vmem [#allocation9], %s286_s10 }
  0x4f   : > { %p299_p2 = scmp.lt.s32.totalorder %s2174_s13, 7  ;;  %p2176_p7 = scmp.ne.s32.totalorder %s2960_s27, 0 }
  0x50   : > { %s3188_s17 = scalar_select %p306_p12, %s2964_s28, 1 }
  0x51   : > { %s3525_s13 = smov (!%p299_p2, %s2174_s13), 7  ;;  %312 = sbr.rel (%p2176_p7) target bundleno = 93 (0x5d), region = 44 }
  0x52   : > { %s308_s16 = scalar_lea.vmem %s3478_s6, %s3188_s17  ;;  %s2175_s24 = sshll.u32 %s3525_s13, 3  ;;  %v345_v0 = vld [vmem:[%s3472_s0] sm:$0xff] (!%p2176_p7)  ;;  %v347_v1 = vld [vmem:[%s3472_s0 + $0x8] sm:$0xff] (!%p2176_p7)  ;;  %v349_v2 = vld [vmem:[%s3472_s0 + $0x10] sm:$0xff] (!%p2176_p7) }
  0x53   : > { %s3197_s1 = scalar_lea.vmem %s3476_s4, %s2175_s24  ;;  %346 = vst [vmem:[#allocation2] sm:$0xff] (!%p2176_p7), %v345_v0  ;;  %348 = vst [vmem:[#allocation2 + $0x8] sm:$0xff] (!%p2176_p7), %v347_v1  ;;  %v351_v3 = vld [vmem:[%s3472_s0 + $0x18] sm:$0xff] (!%p2176_p7)  ;;  %v353_v4 = vld [vmem:[%s3472_s0 + $0x20] sm:$0xff] (!%p2176_p7) }
  0x54   : > { %350 = vst [vmem:[#allocation2 + $0x10] sm:$0xff] (!%p2176_p7), %v349_v2  ;;  %v355_v5 = vld [vmem:[%s3472_s0 + $0x28] sm:$0xff] (!%p2176_p7)  ;;  %352 = vst [vmem:[#allocation2 + $0x18] sm:$0xff] (!%p2176_p7), %v351_v3  ;;  %v357_v6 = vld [vmem:[%s3472_s0 + $0x30] sm:$0xff] (!%p2176_p7) }
  0x55   : > { %354 = vst [vmem:[#allocation2 + $0x20] sm:$0xff] (!%p2176_p7), %v353_v4  ;;  %356 = vst [vmem:[#allocation2 + $0x28] sm:$0xff] (!%p2176_p7), %v355_v5  ;;  %v359_v7 = vld [vmem:[%s3472_s0 + $0x38] sm:$0xff] (!%p2176_p7) }
  0x56   : > { %358 = vst [vmem:[#allocation2 + $0x30] sm:$0xff] (!%p2176_p7), %v357_v6  ;;  %360 = vst [vmem:[#allocation2 + $0x38] sm:$0xff] (!%p2176_p7), %v359_v7 }
  0x58   : > { %368 = vsyncadd [#allocation5], 1024 }
  0x59   : > { %2928 = dma.done.wait [#allocation5], 1024 }
  0x5a   : > { %2929 = vsyncadd [#allocation5], 4294966272  ;;  %vm372_vm0 = vcmask 516096   ;;  %vm374_vm1 = vcmask 0   ;;  %v2981_v8 = vmov 0.0  }
  0x5b   : > { %373 = vst.msk [vmem:[#allocation3] sm:$0x1] %vm372_vm0, %v2981_v8 }
  0x5c   : > { %375 = vst.msk [vmem:[#allocation4] sm:$0x1] %vm374_vm1, %v2981_v8 }
  0x5d PF: > { %s3501_s15 = scalar_lea.vmem [#allocation6], %s3176_s11  ;;  %v1005_v47 = vld [vmem:[%s3197_s1] sm:$0xff]  ;;  %v2982_v52 = vmov 0   ;;  %v1006_v56 = vld [vmem:[%s3197_s1 + $0x8] sm:$0xff]  ;;  %vm1023_vm6 = vcmask 523264   ;;  %vm1542_vm7 = vcmask 130048  }
  0x5e   : > { %v384_v23 = vld [vmem:[%s3501_s15] sm:$0xff]  ;;  %s3502_s20 = smov %s3501_s15  ;;  %2804 = vset.pattern.permute.xlu1 %v2982_v52  ;;  %2805 = vset.pattern.permute.xlu0 %v2982_v52  ;;  %vm2986_vm8 = vmmov 0   ;;  %vm1511_vm9 = vcmask 7168   ;;  %vm2006_vm10 = vcmask 516096   ;;  %vm1526_vm11 = vcmask 0   ;;  %p2182_p3 = scmp.ne.s32.totalorder %s2960_s27, 1 }
  0x5f   : > { %v376_v9 = vld [vmem:[#allocation2] sm:$0xff]  ;;  %v377_v10 = vld [vmem:[#allocation2 + $0x8] sm:$0xff]  ;;  %v3247_v30 = vand.u32 4294901760, %v384_v23  ;;  %v966_v46 = vmul.f32 %v384_v23, %v384_v23  ;;  %1009 = vperm.xlu1 %2804, %v1005_v47  }
  0x60   : > { %v378_v11 = vld [vmem:[#allocation2 + $0x10] sm:$0xff]  ;;  %v387_v12 = vand.u32 4294901760, %v376_v9  ;;  %v390_v13 = vand.u32 4294901760, %v377_v10  ;;  %v379_v14 = vld [vmem:[#allocation2 + $0x18] sm:$0xff]  ;;  %v385_v43 = vld [vmem:[%s3502_s20 + $0x8] sm:$0xff] }
  0x61   : > { %v393_v15 = vand.u32 4294901760, %v378_v11  ;;  %v396_v16 = vand.u32 4294901760, %v379_v14  ;;  %v380_v17 = vld [vmem:[#allocation2 + $0x20] sm:$0xff]  ;;  %v381_v18 = vld [vmem:[#allocation2 + $0x28] sm:$0xff]  ;;  %v3251_v31 = vsub.f32 %v384_v23, %v3247_v30  ;;  %v3278_v50 = vand.u32 4294901760, %v385_v43  ;;  %968 = vadd.xlane.f32.xlu0 %v966_v46 }
  0x62   : > { %v3228_v19 = vpack.c.bf16 %v390_v13, %v387_v12  ;;  %v3230_v20 = vsub.f32 %v376_v9, %v387_v12  ;;  %v3232_v21 = vsub.f32 %v377_v10, %v390_v13  ;;  %v399_v27 = vand.u32 4294901760, %v380_v17  ;;  %v382_v34 = vld [vmem:[#allocation2 + $0x30] sm:$0xff]  ;;  %v383_v35 = vld [vmem:[#allocation2 + $0x38] sm:$0xff] }
  0x63   : > { %v3234_v22 = vsub.f32 %v378_v11, %v393_v15  ;;  %v3238_v24 = vpack.c.bf16 %v396_v16, %v393_v15  ;;  %v3240_v25 = vsub.f32 %v379_v14, %v396_v16  ;;  %v402_v28 = vand.u32 4294901760, %v381_v18  ;;  %2359 = vmatprep.mubr.f32.mxu0 %v3251_v31  ;;  %1014 = vperm.xlu1 %2804, %v1006_v56  }
  0x64   : > { %v2565_v26 = vpack.c.bf16 %v3232_v21, %v3230_v20  ;;  %2534 = vmatprep.subr.bf16.mxu1 %v3228_v19  ;;  %v3254_v32 = vsub.f32 %v380_v17, %v399_v27  ;;  %v461_v36 = vand.u32 4294901760, %v3251_v31  ;;  %v405_v40 = vand.u32 4294901760, %v382_v34 }
  0x65   : > { %v2569_v29 = vpack.c.bf16 %v3240_v25, %v3234_v22  ;;  %2536 = vmatpush3.bf16.xpose.msra.mxu1 %v3228_v19  ;;  %v3256_v33 = vsub.f32 %v381_v18, %v402_v28  ;;  %v3260_v37 = vpack.c.bf16 %v402_v28, %v399_v27  ;;  %v408_v41 = vand.u32 4294901760, %v383_v35 }
  0x66   : > { %2566 = vmatprep.subr.bf16.mxu0 %v2565_v26  ;;  %2538 = vmatprep.subr.bf16.mxu1 %v3238_v24  ;;  %v462_v38 = vsub.f32 %v3251_v31, %v461_v36  ;;  %v482_v44 = vand.u32 4294901760, %v3230_v20  ;;  %v489_v45 = vand.u32 4294901760, %v3232_v21  ;;  %v3274_v48 = vsub.f32 %v382_v34, %v405_v40 }
  0x67   : > { %2568 = vmatpush3.bf16.xpose.msra.mxu0 %v2565_v26  ;;  %v2573_v39 = vpack.c.bf16 %v3256_v33, %v3254_v32  ;;  %v3276_v49 = vsub.f32 %v383_v35, %v408_v41  ;;  %v967_v51 = vmul.f32 %v385_v43, %v385_v43  ;;  %v3281_v53 = vpack.c.bf16 %v408_v41, %v405_v40 }
  0x68   : > { %2570 = vmatprep.subr.bf16.mxu0 %v2569_v29  ;;  %v463_v42 = vand.u32 4294901760, %v462_v38  ;;  %v483_v54 = vsub.f32 %v3230_v20, %v482_v44  ;;  %v490_v55 = vsub.f32 %v3232_v21, %v489_v45  ;;  %v470_v58 = vsub.f32 %v385_v43, %v3278_v50 }
  0x69   : > { %v2577_v57 = vpack.c.bf16 %v3276_v49, %v3274_v48  ;;  %970 = vadd.xlane.f32.xlu0 %v967_v51  ;;  %v496_v61 = vand.u32 4294901760, %v3234_v22  ;;  %v503_v62 = vand.u32 4294901760, %v3240_v25  ;;  %v510_v6 = vand.u32 4294901760, %v3254_v32 }
  0x6a   : > { %2321 = vmatprep.mubr.f32.mxu1 %v463_v42  ;;  %v484_v59 = vand.u32 4294901760, %v483_v54  ;;  %v491_v60 = vand.u32 4294901760, %v490_v55  ;;  %v471_v63 = vand.u32 4294901760, %v470_v58  ;;  %v517_v7 = vand.u32 4294901760, %v3256_v33 }
  0x6b   : > { %v497_v1 = vsub.f32 %v3234_v22, %v496_v61  ;;  %v504_v2 = vsub.f32 %v3240_v25, %v503_v62  ;;  %v511_v10 = vsub.f32 %v3254_v32, %v510_v6  ;;  %v524_v14 = vand.u32 4294901760, %v3274_v48  ;;  %v2177_v32 = vld [vmem:[%s3474_s2] ss:$0 sm:$0xff] }
  0x6c   : > { %v2549_v0 = vpack.c.bf16 %v491_v60, %v484_v59  ;;  %v472_v3 = vsub.f32 %v470_v58, %v471_v63  ;;  %v518_v11 = vsub.f32 %v3256_v33, %v517_v7  ;;  %v531_v15 = vand.u32 4294901760, %v3276_v49 }
  0x6d   : > { %2540 = vmatpush3.bf16.xpose.msra.mxu1 %v3238_v24  ;;  %v498_v4 = vand.u32 4294901760, %v497_v1  ;;  %v505_v5 = vand.u32 4294901760, %v504_v2  ;;  %v512_v12 = vand.u32 4294901760, %v511_v10  ;;  %v525_v17 = vsub.f32 %v3274_v48, %v524_v14 }
  0x6e   : > { %2542 = vmatprep.subr.bf16.mxu1 %v3260_v37  ;;  %v473_v8 = vand.u32 4294901760, %v472_v3  ;;  %v519_v13 = vand.u32 4294901760, %v518_v11  ;;  %v532_v18 = vsub.f32 %v3276_v49, %v531_v15  ;;  %v2597_v26 = vpack.c.bf16 %v489_v45, %v482_v44 }
  0x6f   : > { %2572 = vmatpush3.bf16.xpose.msra.mxu0 %v2569_v29  ;;  %v2553_v9 = vpack.c.bf16 %v505_v5, %v498_v4  ;;  %v526_v22 = vand.u32 4294901760, %v525_v17  ;;  %v2601_v27 = vpack.c.bf16 %v503_v62, %v496_v61  ;;  %v2605_v28 = vpack.c.bf16 %v517_v7, %v510_v6 }
  0x70   : > { %2574 = vmatprep.subr.bf16.mxu0 %v2573_v39  ;;  %v2557_v16 = vpack.c.bf16 %v519_v13, %v512_v12  ;;  %v533_v23 = vand.u32 4294901760, %v532_v18  ;;  %v2609_v29 = vpack.c.bf16 %v531_v15, %v524_v14  ;;  %v2983_v20 = vmov 1.0|1.0  }
  0x72   : > { %v2561_v25 = vpack.c.bf16 %v533_v23, %v526_v22 }
  0x75   : > { %2544 = vmatpush3.bf16.xpose.msra.mxu1 %v3260_v37 }
  0x76   : > { %2546 = vmatprep.subr.bf16.mxu1 %v3281_v53 }
  0x77   : > { %2576 = vmatpush3.bf16.xpose.msra.mxu0 %v2573_v39 }
  0x78   : > { %2578 = vmatprep.subr.bf16.mxu0 %v2577_v57 }
  0x7d   : > { %2548 = vmatpush3.bf16.xpose.msra.mxu1 %v3281_v53 }
  0x7e   : > { %2550 = vmatprep.subr.bf16.mxu1 %v2549_v0 }
  0x7f   : > { %2580 = vmatpush3.bf16.xpose.msra.mxu0 %v2577_v57 }
  0x80   : > { %2582 = vmatprep.subr.bf16.mxu0 %v3228_v19 }
  0x84   : > { %2322 = vmatmul.mubr.f32.vlgmr.msra.gmra.mrb[0].mxu1 %v473_v8 }
  0x85   : > { %2552 = vmatpush3.bf16.xpose.msra.mxu1 %v2549_v0  ;;  %2340 = vmatprep.mubr.f32.mxu1 %v3247_v30 }
  0x86   : > { %2360 = vmatmul.mubr.f32.vlgmr.msra.gmra.mrb[0].mxu0 %v470_v58  ;;  %2554 = vmatprep.subr.bf16.mxu1 %v2553_v9  ;;  %v2178_v58 = vld [vmem:[%s3475_s3] ss:$0 sm:$0xff] }
  0x87   : > { %2584 = vmatpush3.bf16.xpose.msra.mxu0 %v3228_v19  ;;  %2378 = vmatprep.mubr.f32.mxu0 %v461_v36 }
  0x88   : > { %2586 = vmatprep.subr.bf16.mxu0 %v3238_v24 }
  0x8d   : > { %2556 = vmatpush3.bf16.xpose.msra.mxu1 %v2553_v9 }
  0x8e   : > { %2558 = vmatprep.subr.bf16.mxu1 %v2557_v16 }
  0x8f   : > { %2588 = vmatpush3.bf16.xpose.msra.mxu0 %v3238_v24 }
  0x90   : > { %2590 = vmatprep.subr.bf16.mxu0 %v3260_v37 }
  0x95   : > { %2560 = vmatpush3.bf16.xpose.msra.mxu1 %v2557_v16 }
  0x96   : > { %2562 = vmatprep.subr.bf16.mxu1 %v2561_v25 }
  0x97   : > { %2592 = vmatpush3.bf16.xpose.msra.mxu0 %v3260_v37 }
  0x98   : > { %2594 = vmatprep.subr.bf16.mxu0 %v3281_v53 }
  0x9d   : > { %2564 = vmatpush3.bf16.xpose.msra.mxu1 %v2561_v25 }
  0x9f   : > { %2596 = vmatpush3.bf16.xpose.msra.mxu0 %v3281_v53 }
  0xa0   : > { %2598 = vmatprep.subr.bf16.mxu0 %v2597_v26 }
  0xa4   : > { %2341 = vmatmul.mubr.f32.vlgmr.msra.gmra.mrb[0].mxu1 %v3278_v50 }
  0xa6   : > { %2379 = vmatmul.mubr.f32.vlgmr.msra.gmra.mrb[0].mxu0 %v471_v63 }
  0xa7   : > { %2600 = vmatpush3.bf16.xpose.msra.mxu0 %v2597_v26  ;;  %2397 = vmatprep.mubr.f32.mxu0 %v3247_v30 }
  0xa8   : > { %2602 = vmatprep.subr.bf16.mxu0 %v2601_v27 }
  0xaf   : > { %2604 = vmatpush3.bf16.xpose.msra.mxu0 %v2601_v27 }
  0xb0   : > { %2606 = vmatprep.subr.bf16.mxu0 %v2605_v28 }
  0xb7   : > { %2608 = vmatpush3.bf16.xpose.msra.mxu0 %v2605_v28 }
  0xb8   : > { %2610 = vmatprep.subr.bf16.mxu0 %v2609_v29 }
  0xbf   : > { %2612 = vmatpush3.bf16.xpose.msra.mxu0 %v2609_v29 }
  0xc0   : > { %2614 = vmatprep.subr.bf16.mxu0 %v3228_v19 }
  0xc6   : > { %2398 = vmatmul.mubr.f32.vlgmr.msra.gmra.mrb[0].mxu0 %v3278_v50 }
  0xc7   : > { %2616 = vmatpush3.bf16.xpose.msra.mxu0 %v3228_v19  ;;  %2416 = vmatprep.mubr.f32.mxu0 %v3247_v30  ;;  %v2984_v19 = vmov 0.0  }
  0xc8   : > { %2618 = vmatprep.subr.bf16.mxu0 %v3238_v24  ;;  %2438 = vmatprep.subr.mxu1 %v2984_v19 }
  0xc9   : > { %2439 = vmatpush3.msra.mxu1 %v2984_v19 }
  0xca   : > { %2443 = vmatprep.subr.mxu1 %v2984_v19 }
  0xcf   : > { %2620 = vmatpush3.bf16.xpose.msra.mxu0 %v3238_v24 }
  0xd0   : > { %2622 = vmatprep.subr.bf16.mxu0 %v3260_v37 }
  0xd7   : > { %2624 = vmatpush3.bf16.xpose.msra.mxu0 %v3260_v37 }
  0xd8   : > { %2626 = vmatprep.subr.bf16.mxu0 %v3281_v53 }
  0xde   : > { %v1010_v48 = vpop.permute.xlu1 %1009 }
  0xdf   : > { %2628 = vmatpush3.bf16.xpose.msra.mxu0 %v3281_v53 }
  0xe0   : > { %2629 = vmatprep.subr.bf16.mxu0 %v2983_v20 }
  0xe2   : > { %v1015_v62 = vpop.permute.xlu1 %1014 }
  0xe6   : > { %2417 = vmatmul.mubr.f32.vlgmr.msra.gmra.mrb[0].mxu0 %v3278_v50 }
  0xe7   : > { %2630 = vmatpush3.bf16.msra.mxu0 %v2983_v20 }
  0xe8   : > { %2631 = vmatprep.subr.bf16.mxu0 %v2983_v20 }
  0xeb   : > { %2632 = vmatpush3.bf16.msra.mxu0 %v2983_v20 }
  0xec   : > { %2633 = vmatprep.subr.bf16.mxu0 %v2983_v20 }
  0xee   : > { %v969_v30 = vpop.xlane.xlu0 %968 }
  0xef   : > { %2634 = vmatpush3.bf16.msra.mxu0 %v2983_v20  ;;  %v979_v39 = vadd.f32 %v2177_v32, %v969_v30 }
  0xf0   : > { %2635 = vmatprep.subr.bf16.mxu0 %v2983_v20 }
  0xf3   : > { %2636 = vmatpush3.bf16.msra.mxu0 %v2983_v20 }
  0xf6   : > { %v971_v31 = vpop.xlane.xlu0 %970 }
  0xf7   : > { %v980_v36 = vadd.f32 %v2177_v32, %v971_v31 }
 0x177   : > { %v2342_v21 = vpop.f32.mrb[0].mxu1 }
 0x178   : > { %v586_v24 = vpop.f32.mrb[1].mxu1 }
 0x1b9   : > { %v2418_v33 = vpop.f32.mrb[0].mxu0 }
 0x1ba   : > { %v2671_v34 = vadd.f32 %v2418_v33, %v2342_v21  ;;  %v956_v35 = vpop.f32.mrb[1].mxu0 }
 0x1bb   : > { %v2672_v37 = vadd.f32 %v956_v35, %v586_v24 }
 0x1bc   : > { %v982_v38 = vmul.f32 2.0, %v2671_v34 }
 0x1bd   : > { %v981_v40 = vmul.f32 2.0, %v2672_v37 }
 0x1be   : > { %v984_v41 = vsub.f32 %v980_v36, %v982_v38 }
 0x1bf   : > { %v983_v42 = vsub.f32 %v979_v39, %v981_v40  ;;  %v1544_v39 = vsel %vm1542_vm7, 1.0, %v2982_v52 }
 0x1c0   : > { %v986_v43 = vmax.f32 %v984_v41, 0.0  ;;  %v1614_v40 = vsub.f32 %v1544_v39, %v1544_v39 }
 0x1c1   : > { %v985_v44 = vmax.f32 %v983_v42, 0.0 }
 0x1c2   : > { %2806 = vrsqrt.f32 %v986_v43  ;;  %vm996_vm2 = vcmp.eq.f32.partialorder %v986_v43, inf  ;;  %v999_v50 = vand.u32 2147483648, %v986_v43  ;;  %vm998_vm4 = vcmp.eq.f32.partialorder %v986_v43, 0.0 }
 0x1c3   : > { %2808 = vrsqrt.f32 %v985_v44  ;;  %vm989_vm3 = vcmp.eq.f32.partialorder %v985_v44, inf  ;;  %v992_v51 = vand.u32 2147483648, %v985_v44  ;;  %vm991_vm5 = vcmp.eq.f32.partialorder %v985_v44, 0.0 }
 0x1c4   : > { %v1615_v41 = vand.u32 4294901760, %v1614_v40 }
 0x1c6   : > { %v1616_v42 = vsub.f32 %v1614_v40, %v1615_v41 }
 0x1c8   : > { %v1617_v52 = vand.u32 4294901760, %v1616_v42 }
 0x1cc   : > { %v2807_v45 = vpop.eup %2806 }
 0x1cd   : > { %v2809_v46 = vpop.eup %2808  ;;  %v995_v47 = vmul.f32 %v2807_v45, %v986_v43 }
 0x1ce   : > { %v988_v49 = vmul.f32 %v2809_v46, %v985_v44 }
 0x1cf   : > { %v997_v53 = vsel %vm996_vm2, %v986_v43, %v995_v47  ;;  %v2985_v43 = vmov 0.0|0.0  }
 0x1d0   : > { %v990_v54 = vsel %vm989_vm3, %v985_v44, %v988_v49  ;;  %v1000_v55 = vsel %vm998_vm4, %v999_v50, %v997_v53  ;;  %v2987_v44 = vmov 1.0  }
 0x1d1   : > { %v993_v56 = vsel %vm991_vm5, %v992_v51, %v990_v54  ;;  %v1002_v57 = vsub.f32 0.0, %v1000_v55 }
 0x1d2   : > { %v1001_v59 = vsub.f32 0.0, %v993_v56 }
 0x1d3   : > { %v1004_v60 = vmul.f32 2.0, %v1002_v57 }
 0x1d4   : > { %v1003_v61 = vmul.f32 2.0, %v1001_v59 }
 0x1d5   : > { %v1018_v63 = vsub.f32 %v1004_v60, %v1015_v62  ;;  %v1536_v0 = vsub.f32 %v1004_v60, %v2178_v58 }
 0x1d6   : > { %v1017_v1 = vsub.f32 %v1003_v61, %v1010_v48  ;;  %v1535_v2 = vsub.f32 %v1003_v61, %v2178_v58 }
 0x1d7   : > { %v1021_v3 = vmul.f32 1.442695, %v1018_v63  ;;  %v1539_v6 = vmul.f32 1.442695, %v1536_v0 }
 0x1d8   : > { %v1019_v4 = vmul.f32 1.442695, %v1017_v1  ;;  %v1537_v5 = vmul.f32 1.442695, %v1535_v2 }
 0x1d9   : > { %2810 = vpow2.f32 %v1021_v3 }
 0x1da   : > { %2812 = vpow2.f32 %v1019_v4 }
 0x1db   : > { %2814 = vpow2.f32 %v1537_v5 }
 0x1dc   : > { %2816 = vpow2.f32 %v1539_v6 }
 0x1e3   : > { %v2811_v7 = vpop.eup %2810 }
 0x1e4   : > { %v2813_v8 = vpop.eup %2812  ;;  %v1028_v9 = vsel %vm1023_vm6, %v2811_v7, 0  ;;  %v1541_v7 = vld [vmem:[#allocation3] sm:$0x1] }
 0x1e5   : > { %v2815_v10 = vpop.eup %2814  ;;  %v1025_v11 = vsel %vm1023_vm6, %v2813_v8, 0  ;;  %v1105_v12 = vand.u32 4294901760, %v1028_v9 }
 0x1e6   : > { %v2817_v13 = vpop.eup %2816  ;;  %v1095_v14 = vand.u32 4294901760, %v1025_v11  ;;  %v1547_v15 = vand.u32 4294901760, %v2815_v10 }
 0x1e7   : > { %v1106_v16 = vsub.f32 %v1028_v9, %v1105_v12  ;;  %v1550_v17 = vand.u32 4294901760, %v2817_v13 }
 0x1e8   : > { %2440 = vmatprep.mubr.f32.mxu1 %v1095_v14  ;;  %v1096_v18 = vsub.f32 %v1025_v11, %v1095_v14  ;;  %v3354_v22 = vsub.f32 %v2815_v10, %v1547_v15 }
 0x1e9   : > { %2441 = vmatmul.mubr.f32.vlgmr.msra.gmra.mrb[2].mxu1 %v1105_v12  ;;  %v1107_v23 = vand.u32 4294901760, %v1106_v16  ;;  %v3356_v25 = vpack.c.bf16 %v1550_v17, %v1547_v15  ;;  %v1632_v26 = vsub.f32 %v2817_v13, %v1550_v17 }
 0x1ea   : > { %2444 = vmatpush3.msra.mxu1 %v2984_v19  ;;  %2445 = vmatprep.mubr.f32.mxu1 %v1096_v18  ;;  %v1097_v27 = vand.u32 4294901760, %v1096_v18  ;;  %v1626_v28 = vand.u32 4294901760, %v3354_v22 }
 0x1eb   : > { %2637 = vmatprep.subr.bf16.mxu1 %v2983_v20  ;;  %v1108_v29 = vsub.f32 %v1106_v16, %v1107_v23  ;;  %v1633_v21 = vand.u32 4294901760, %v1632_v26  ;;  %v2660_v24 = vpack.c.bf16 %v1632_v26, %v3354_v22 }
 0x1ec   : > { %v1098_v30 = vsub.f32 %v1096_v18, %v1097_v27  ;;  %v1627_v31 = vsub.f32 %v3354_v22, %v1626_v28  ;;  %v1506_v22 = vld [vmem:[#allocation4] sm:$0x1] }
 0x1ed   : > { %v1634_v32 = vsub.f32 %v1632_v26, %v1633_v21  ;;  %v2666_v33 = vpack.c.bf16 %v1633_v21, %v1626_v28  ;;  %v1109_v36 = vand.u32 4294901760, %v1108_v29 }
 0x1ee   : > { %v1099_v34 = vand.u32 4294901760, %v1098_v30  ;;  %v1628_v35 = vand.u32 4294901760, %v1627_v31 }
 0x1ef   : > { %v1635_v37 = vand.u32 4294901760, %v1634_v32 }
 0x1f0   : > { %2435 = vmatprep.mubr.f32.mxu0 %v1099_v34 }
 0x1f1   : > { %2436 = vmatmul.mubr.f32.vlgmr.msra.gmra.mrb[2].mxu0 %v1109_v36  ;;  %2446 = vmatmul.mubr.f32.vlgmr.msra.gmra.mrb[2].mxu1 %v1106_v16  ;;  %v2657_v38 = vpack.c.bf16 %v1635_v37, %v1628_v35 }
 0x1f2   : > { %2638 = vmatpush3.bf16.msra.mxu1 %v2983_v20  ;;  %2464 = vmatprep.mubr.f32.mxu1 %v1097_v27 }
 0x1f3   : > { %2639 = vmatprep.subr.bf16.mxu1 %v2983_v20 }
 0x1f6   : > { %2640 = vmatpush3.bf16.msra.mxu1 %v2983_v20 }
 0x1f7   : > { %2641 = vmatprep.subr.bf16.mxu1 %v2983_v20 }
 0x1fa   : > { %2642 = vmatpush3.bf16.msra.mxu1 %v2983_v20 }
 0x1fb   : > { %2643 = vmatprep.subr.bf16.mxu1 %v2983_v20 }
 0x1fe   : > { %2644 = vmatpush3.bf16.msra.mxu1 %v2983_v20 }
 0x1ff   : > { %2467 = vmatprep.subr.mxu1 %v2984_v19 }
 0x201   : > { %2465 = vmatmul.mubr.f32.vlgmr.msra.gmra.mrb[2].mxu1 %v1107_v23 }
 0x202   : > { %2468 = vmatpush3.msra.mxu1 %v2984_v19  ;;  %2469 = vmatprep.mubr.f32.mxu1 %v1095_v14 }
 0x203   : > { %2645 = vmatprep.subr.bf16.mxu1 %v2983_v20 }
 0x209   : > { %2470 = vmatmul.mubr.f32.vlgmr.msra.gmra.mrb[2].mxu1 %v1105_v12 }
 0x20a   : > { %2646 = vmatpush3.bf16.msra.mxu1 %v2983_v20  ;;  %2488 = vmatprep.mubr.f32.mxu1 %v1095_v14 }
 0x20b   : > { %2647 = vmatprep.subr.bf16.mxu1 %v2983_v20 }
 0x20e   : > { %2648 = vmatpush3.bf16.msra.mxu1 %v2983_v20 }
 0x20f   : > { %2649 = vmatprep.subr.bf16.mxu1 %v2983_v20 }
 0x212   : > { %2650 = vmatpush3.bf16.msra.mxu1 %v2983_v20 }
 0x213   : > { %2651 = vmatprep.subr.bf16.mxu1 %v2983_v20 }
 0x216   : > { %2652 = vmatpush3.bf16.msra.mxu1 %v2983_v20 }
 0x217   : > { %2653 = vmatprep.subr.bf16.mxu1 %v2985_v43 }
 0x219   : > { %2489 = vmatmul.mubr.f32.vlgmr.msra.gmra.mrb[2].mxu1 %v1105_v12 }
 0x21a   : > { %2655 = vmatpush3.bf16.msra.mxu1 %v3356_v25  ;;  %2495 = vmatprep.mubr.msk.f32.mxu1 %vm2986_vm8, %v2984_v19 }
 0x21b   : > { %2656 = vmatprep.subr.bf16.mxu1 %v2985_v43 }
 0x21d   : > { %2496 = vmatmul.mubr.f32.vlgmr.msra.gmra.mrb[4].mxu1 %v1617_v52 }
 0x21e   : > { %2658 = vmatpush3.bf16.msra.mxu1 %v2657_v38  ;;  %2502 = vmatprep.mubr.msk.f32.mxu1 %vm2986_vm8, %v2984_v19 }
 0x21f   : > { %2659 = vmatprep.subr.bf16.mxu1 %v2985_v43 }
 0x221   : > { %2503 = vmatmul.mubr.msk.f32.vlgmr.msra.gmra.mrb[6].mxu1 %vm1542_vm7, %v2987_v44 }
 0x222   : > { %2661 = vmatpush3.bf16.msra.mxu1 %v2660_v24  ;;  %2509 = vmatprep.mubr.msk.f32.mxu1 %vm2986_vm8, %v2984_v19 }
 0x223   : > { %2662 = vmatprep.subr.bf16.mxu1 %v2985_v43 }
 0x225   : > { %2510 = vmatmul.mubr.f32.vlgmr.msra.gmra.mrb[8].mxu1 %v1614_v40 }
 0x226   : > { %2664 = vmatpush3.bf16.msra.mxu1 %v3356_v25  ;;  %2516 = vmatprep.mubr.msk.f32.mxu1 %vm2986_vm8, %v2984_v19 }
 0x227   : > { %2665 = vmatprep.subr.bf16.mxu1 %v2985_v43 }
 0x229   : > { %2517 = vmatmul.mubr.f32.vlgmr.msra.gmra.mrb[10].mxu1 %v1615_v41 }
 0x22a   : > { %2667 = vmatpush3.bf16.msra.mxu1 %v2666_v33  ;;  %2523 = vmatprep.mubr.msk.f32.mxu1 %vm2986_vm8, %v2984_v19 }
 0x22b   : > { %2668 = vmatprep.subr.bf16.mxu1 %v2985_v43 }
 0x22d   : > { %2524 = vmatmul.mubr.msk.f32.vlgmr.msra.gmra.mrb[12].mxu1 %vm1542_vm7, %v2987_v44 }
 0x22e   : > { %2670 = vmatpush3.bf16.msra.mxu1 %v3356_v25  ;;  %2530 = vmatprep.mubr.msk.f32.mxu1 %vm2986_vm8, %v2984_v19 }
 0x231   : > { %2531 = vmatmul.mubr.msk.f32.vlgmr.msra.gmra.mrb[14].mxu1 %vm1542_vm7, %v2987_v44 }
 0x2c4   : > { %v2437_v20 = vpop.f32.mrb[2].mxu0 }
 0x2c5   : > { %v1101_v45 = vpop.f32.mrb[3].mxu0 }
 0x2ec   : > { %v2490_v46 = vpop.f32.mrb[2].mxu1 }
 0x2ed   : > { %v2673_v47 = vadd.f32 %v2490_v46, %v2437_v20  ;;  %v1496_v48 = vpop.f32.mrb[3].mxu1 }
 0x2ee   : > { %v2674_v49 = vadd.f32 %v1496_v48, %v1101_v45 }
 0x2ef   : > { %2818 = vlog2.f32 %v2673_v47 }
 0x2f0   : > { %2820 = vlog2.f32 %v2674_v49  ;;  %v1619_v19 = vpop.f32.mrb[4].mxu1 }
 0x2f1   : > { %v2497_v58 = vpop.f32.mrb[5].mxu1 }
 0x2f4   : > { %v1700_v59 = vpop.f32.mrb[6].mxu1 }
 0x2f5   : > { %v1701_v60 = vadd.f32 %v1700_v59, %v1619_v19  ;;  %v2504_v61 = vpop.f32.mrb[7].mxu1 }
 0x2f8   : > { %v1776_v62 = vpop.f32.mrb[8].mxu1 }
 0x2f9   : > { %v2819_v50 = vpop.eup %2818  ;;  %v1777_v63 = vadd.f32 %v1776_v62, %v1701_v60  ;;  %v2511_v0 = vpop.f32.mrb[9].mxu1 }
 0x2fa   : > { %v2821_v51 = vpop.eup %2820  ;;  %v1510_v53 = vmul.f32 0.6931472, %v2819_v50 }
 0x2fb   : > { %v1508_v54 = vmul.f32 0.6931472, %v2821_v51 }
 0x2fc   : > { %v1513_v55 = vsel %vm1511_vm9, %v1510_v53, 0.0  ;;  %v1851_v1 = vpop.f32.mrb[10].mxu1 }
 0x2fd   : > { %v1512_v56 = vsel %vm1511_vm9, %v1508_v54, 0.0  ;;  %v1852_v2 = vadd.f32 %v1851_v1, %v1777_v63  ;;  %v2518_v3 = vpop.f32.mrb[11].mxu1 }
 0x2fe   : > { %v1514_v57 = vadd.f32 %v1513_v55, %v1512_v56 }
 0x300   : > { %1515 = vadd.xlane.f32.xlu0 %v1514_v57  ;;  %v1928_v4 = vpop.f32.mrb[12].mxu1 }
 0x301   : > { %v1929_v5 = vadd.f32 %v1928_v4, %v1852_v2  ;;  %v2525_v6 = vpop.f32.mrb[13].mxu1 }
 0x304   : > { %v2001_v8 = vpop.f32.mrb[14].mxu1 }
 0x305   : > { %v2002_v9 = vadd.f32 %v2001_v8, %v1929_v5  ;;  %v2532_v10 = vpop.f32.mrb[15].mxu1 }
 0x307   : > { %v2005_v11 = vadd.f32 %v2002_v9, %v1541_v7 }
 0x309   : > { %2007 = vst.msk [vmem:[#allocation3] sm:$0x1] %vm2006_vm10, %v2005_v11 }
 0x310   : > { %v2012_v26 = vld [vmem:[#allocation3] sm:$0x1] (!%p2182_p3) }
 0x311   : > { %2013 = vst.msk [vmem:[%s3201_s30] sm:$0x1] (!%p2182_p3), %vm2006_vm10, %v2012_v26 }
 0x38d   : > { %v1516_v12 = vpop.xlane.xlu0 %1515 }
 0x38e   : > { %v1517_v13 = vrot.slane %v1516_v12, 4 }
 0x390   : > { %v1518_v14 = vadd.f32 %v1517_v13, %v1516_v12 }
 0x392   : > { %v1519_v15 = vrot.slane %v1518_v14, 2 }
 0x394   : > { %v1520_v16 = vadd.f32 %v1519_v15, %v1518_v14 }
 0x396   : > { %v1521_v17 = vrot.slane %v1520_v16, 1 }
 0x398   : > { %v1522_v18 = vadd.f32 %v1521_v17, %v1520_v16 }
 0x39a   : > { %2691 = vpush %v1522_v18 }
 0x3c9   : > { %2011 = sbr.rel (%p2182_p3) target bundleno = 984 (0x3d8), region = 82 }
 0x3cb   : > { %s2692_s14 = spop %2691 }
 0x3cc   : > { %v1524_v23 = vstv %s2692_s14 }
 0x3cd   : > { %v1525_v25 = vadd.f32 %v1524_v23, %v1506_v22 }
 0x3cf   : > { %1527 = vst.msk [vmem:[#allocation4] sm:$0x1] %vm1526_vm11, %v1525_v25 }
 0x3d6   : > { %v2014_v27 = vld [vmem:[#allocation4] sm:$0x1] }
 0x3d7   : > { %2015 = vst.msk [vmem:[%s308_s16] sm:$0x1] %vm1526_vm11, %v2014_v27 }
 0x3d8 PF: > { %s2183_s9 = sshll.u32 %s2964_s28, 4  ;;  %s3503_s8 = sld [smem:[#allocation21_spill]] }
 0x3d9   : > { %s2032_s20 = sshll.u32 %s3201_s30, 4  ;;  %s2017_s1 = scalar_lea.sflag [#allocation8], %s286_s10  ;;  %s2033_s20 = int_to_ptr.vmem [resolvable:$true] %s2032_s20 }
 0x3da   : > { %s2852_s11 = scalar_lea.vmem %s2033_s20, 16  ;;  %p3504_p1 = scmp.ne.s32.totalorder %s3496_s29, 0 }
 0x3db   : > { %p2853_p0 = scmp.ne.s32.totalorder %s2033_s20, %s2852_s11  ;;  %s2988_s17 = smov [#allocation9]  }
 0x3dc   : > { %s2856_s16 = sshll.u32 %s2988_s17, 4  ;;  %s2857_s16 = int_to_ptr.vmem [resolvable:$false] %s2856_s16 }
 0x3dd   : > { %p2854_p4 = pnand %p2853_p0, %p3504_p1  ;;  %s2858_s24 = scalar_lea.vmem %s2857_s16, 32 }
 0x3de   : > { %s3413_s15 = scalar_lea.hbm %s3503_s8, %s2183_s9  ;;  %p2859_p5 = scmp.lt.s32.totalorder %s2033_s20, %s2857_s16 }
 0x3df   : > { %p2855_p8 = pneg %p2854_p4  ;;  %p2860_p10 = scmp.lt.s32.totalorder %s2858_s24, %s2852_s11 }
 0x3e1   : > { %p2861_p11 = por %p2860_p10, %p2859_p5 }
 0x3e3   : > { %p2862_p6 = pnand %p2861_p11, %p2855_p8 }
 0x3e5   : > { %2865 = shalt.err (!%p2862_p6)
}
 0x3e6   : > { %s2866_s28 = scalar_lea.hbm %s3413_s15, 16  ;;  %s2870_s19 = scalar_lea.hbm %s3503_s8, 32 }
 0x3e7   : > { %p2867_p9 = scmp.ne.s32.totalorder %s3413_s15, %s2866_s28  ;;  %p2871_p2 = scmp.lt.u32.totalorder %s3413_s15, %s3503_s8 }
 0x3e8   : > { %p2872_p7 = scmp.lt.u32.totalorder %s2870_s19, %s2866_s28  ;;  %p2874_p0 = scmp.lt.u32.totalorder %s2866_s28, %s3413_s15 }
 0x3e9   : > { %p2868_p13 = pnand %p2867_p9, %p3504_p1 }
 0x3ea   : > { %p2873_p3 = por %p2872_p7, %p2871_p2 }
 0x3eb   : > { %p2869_p12 = pneg %p2868_p13 }
 0x3ec   : > { %p2875_p4 = por %p2874_p0, %p2873_p3 }
 0x3ee   : > { %p2876_p8 = pnand %p2875_p4, %p2869_p12 }
 0x3f0   : > { %2879 = shalt.err (!%p2876_p8)
}
 0x3f1   : > { %2695 = dma.vmem_to_hbm [thread:$0]  (%p3504_p1), %s2033_s20, 16, %s3413_s15, %s2017_s1  }
 0x3f2 PF: > { %p2706_p5 = scmp.ge.s32.totalorder %s2976_s7, 2  ;;  %s2047_s26 = sand.u32 1, %s2936_s21  }
 0x3f3   : > { %p3505_p10 = scmp.ne.s32.totalorder %s3498_s18, 0  ;;  %s2048_s9 = scalar_lea.sflag [#allocation8], %s2047_s26 }
 0x3f5   : > { %p2702_p11 = pnand %p2706_p5, %p3505_p10 }
 0x3f7   : > { %2931 = dma.done.wait (!%p2702_p11), %s2048_s9, 16  }
 0x3f8   : > { %2933 = vsyncadd (!%p2702_p11), %s2048_s9, 4294967280  ;;  %s23_s7 = sadd.s32 1, %s2976_s7   ;;  %s3506_s29 = sld [smem:[#allocation14_spill]] }
 0x3f9   : > { %p20_p6 = scmp.ge.s32.totalorder %s23_s7, 6   ;;  %s3507_s26 = sld [smem:[#allocation19_spill]] }
 0x3fa   : > { %s3508_s27 = sld [smem:[#allocation15_spill]]  ;;  %s3509_s28 = sld [smem:[#allocation16_spill]] }
 0x3fb   : > { %s3510_s13 = sld [smem:[#allocation17_spill]]  ;;  %s3511_s30 = sld [smem:[#allocation18_spill]] }
 0x3fc   : > { %s3512_s21 = smov %s2940_s22  ;;  %s3513_s22 = smov %s2944_s23 }
 0x3fd   : > { %s3514_s23 = smov %s3112_s12  ;;  %s3515_s24 = smov %s2952_s25 }
 0x3fe   : > { %s3516_s25 = smov %s3506_s29  ;;  %22 = sbr.rel (!%p20_p6) target bundleno = 12 (0xc), region = 146 }
 0x401   : > { %s3517_s29 = smov %s3510_s13 }
 0x405   :  { %2058 = vsyncpa [#allocation7], 1 }
 0x406   :  { %2060 = vsyncpa [#allocation7 + $0x1], 1 }
 0x407   :  { %2061 = vsyncpa [#allocation8], 1 }
 0x408   :  { %2063 = vsyncpa [#allocation8 + $0x1], 1 }
 0x409   :  { %2064 = vsyncmov [#allocation5] }
 0x40c   :  { %s2065_s12 = vpop.sfrf %2064 }
 0x40d   :  { %p2186_p1 = scmp.ne.s32.totalorder %s2065_s12, 0 }
 0x40f   :  { %2069 = shalt.err (%p2186_p1)  }

</bundles_post_ra>
